<compile_context>
chip_gen: v7x
topology: tpu7x:2x2x1
jax: 0.10.0
libtpu: 0.0.40
codegen_flags: <defaults>
</compile_context>

<pallas_src>
import math

import jax
import jax.numpy as jnp
from jax.experimental import pallas as pl
from jax.experimental.pallas import tpu as pltpu

_MIB = 1024 * 1024


def _round_up(x, m):
    return (x + m - 1) // m * m


def _pick_tile(n_pad, max_tile, prefer_split=False):
    """Largest multiple-of-128 tile <= max_tile that divides n_pad.

    With prefer_split=True, prefer the largest tile that yields >= 2 tiles
    along the axis (so the 'parallel' axis can shard across v7x's 2 TCs).
    """
    cands = [t for t in (1024, 896, 768, 640, 512, 384, 256, 128)
             if t <= max_tile and n_pad % t == 0]
    if not cands:
        return 128
    if prefer_split:
        for t in cands:
            if n_pad // t >= 2:
                return t
    return cands[0]


def _make_gcn_kernel(tk, support_resident):
    """Builds the aggregation kernel: out = relu(adj @ support)."""

    def kernel(adj_ref, sup_ref, out_ref, acc_ref):
        k = pl.program_id(1)

        @pl.when(k == 0)
        def _():
            acc_ref[...] = jnp.zeros_like(acc_ref)

        if support_resident:
            # support is fully VMEM-resident; slice the k-th (tk, f_out_p) band.
            align = tk & (-tk)  # largest power-of-two divisor of tk (>= 128)
            off = pl.multiple_of(k * tk, align)
            sup = sup_ref[pl.ds(off, tk), :]
        else:
            sup = sup_ref[...]

        # acc[i] += adj[i, k] @ support[k]   (bf16 operands, f32 MXU accumulation)
        acc_ref[...] += jnp.dot(adj_ref[...], sup,
                                preferred_element_type=jnp.float32)

        @pl.when(k == pl.num_programs(1) - 1)
        def _():
            out_ref[...] = jnp.maximum(acc_ref[...], 0.0).astype(out_ref.dtype)

    return kernel


def graph_convolution(x, weight, adj, *, compute_dtype=jnp.bfloat16,
                      max_row_tile=1024, max_k_tile=1024):
    """relu(adj @ (x @ weight)) with a tiled, pipelined Pallas kernel.

    The feature transform x @ W is hoisted to a single XLA matmul; the Pallas
    kernel streams adj in (tm, tk) bf16 tiles over a 2-D grid
    (row tiles = "parallel", contraction tiles = "arbitrary") and accumulates
    in an f32 VMEM scratch buffer.
    """
    n, f_in = x.shape
    f_out = weight.shape[1]
    assert adj.shape == (n, n)
    assert weight.shape[0] == f_in

    out_dtype = x.dtype
    out_isz = jnp.dtype(out_dtype).itemsize
    c_isz = jnp.dtype(compute_dtype).itemsize

    # Lane-dense output width (unmasked vector stores); N padded only to 128.
    f_out_p = _round_up(f_out, 128)
    n_pad = _round_up(n, 128)

    # ---- hoisted feature transform: support = x @ W (computed once) ----
    # TODO(synk): keep support in f32 if bf16 double-rounding is an accuracy
    #             concern for very large F_in; kernel is HBM-bound on adj anyway.
    w_c = weight.astype(compute_dtype)
    if f_out_p != f_out:
        w_c = jnp.pad(w_c, ((0, 0), (0, f_out_p - f_out)))
    support = jnp.dot(x.astype(compute_dtype), w_c,
                      preferred_element_type=jnp.float32).astype(compute_dtype)
    if n_pad != n:
        support = jnp.pad(support, ((0, n_pad - n), (0, 0)))

    # ---- adjacency: pad/cast only when necessary (dominant HBM array) ----
    adj_c = adj
    if n_pad != n:
        adj_c = jnp.pad(adj_c, ((0, n_pad - n), (0, n_pad - n)))
    if adj_c.dtype != compute_dtype:
        adj_c = adj_c.astype(compute_dtype)

    # ---- tile selection ----
    # Row tile: keep acc + double-buffered out tiles within ~8 MiB and prefer
    # >= 2 row tiles so the 'parallel' axis shards across v7x's 2 TensorCores.
    row_bytes = f_out_p * (4 + 2 * out_isz)
    max_tm = max(128, (8 * _MIB // row_bytes) // 128 * 128)
    tm = _pick_tile(n_pad, min(max_row_tile, max_tm), prefer_split=True)
    # Contraction tile: as large as practical (streams adj efficiently).
    tk = _pick_tile(n_pad, max_k_tile)

    # Keep support fully VMEM-resident (one DMA, single pass over adj) when it
    # fits comfortably; otherwise stream (tk, f_out_p) tiles indexed by k.
    sup_bytes = n_pad * f_out_p * c_isz
    resident = 2 * sup_bytes <= 8 * _MIB  # count 2 buffers conservatively

    if resident:
        sup_spec = pl.BlockSpec((n_pad, f_out_p), lambda i, k: (0, 0))
        sup_vmem = 2 * sup_bytes
    else:
        sup_spec = pl.BlockSpec((tk, f_out_p), lambda i, k: (k, 0))
        sup_vmem = 2 * tk * f_out_p * c_isz

    adj_vmem = 2 * tm * tk * c_isz
    acc_vmem = tm * f_out_p * 4
    out_vmem = 2 * tm * f_out_p * out_isz
    footprint = adj_vmem + sup_vmem + acc_vmem + out_vmem
    # Derived limit with headroom; stays well under v7x's 64 MiB physical VMEM.
    vmem_limit = int(min(48 * _MIB, max(16 * _MIB, footprint + 8 * _MIB)))

    grid = (n_pad // tm, n_pad // tk)

    out = pl.pallas_call(
        _make_gcn_kernel(tk, resident),
        out_shape=jax.ShapeDtypeStruct((n_pad, f_out_p), out_dtype),
        grid_spec=pltpu.PrefetchScalarGridSpec(
            num_scalar_prefetch=0,
            grid=grid,
            in_specs=[
                pl.BlockSpec((tm, tk), lambda i, k: (i, k)),  # adj tile (streamed)
                sup_spec,                                      # support (resident/streamed)
            ],
            out_specs=pl.BlockSpec((tm, f_out_p), lambda i, k: (i, 0)),
            scratch_shapes=[pltpu.VMEM((tm, f_out_p), jnp.float32)],
        ),
        compiler_params=pltpu.CompilerParams(
            # Row tiles are independent -> "parallel" (megacore sharding on v7x);
            # the adj contraction axis carries the accumulator -> "arbitrary".
            dimension_semantics=("parallel", "arbitrary"),
            vmem_limit_bytes=vmem_limit,
        ),
    )(adj_c, support)

    if n_pad != n or f_out_p != f_out:
        out = out[:n, :f_out]
    return out


def xavier_uniform(key, fan_in, fan_out, dtype=jnp.float32):
    # Matches torch.nn.init.xavier_uniform_ (gain=1).
    bound = math.sqrt(6.0 / (fan_in + fan_out))
    return jax.random.uniform(
        key, (fan_in, fan_out), dtype=dtype, minval=-bound, maxval=bound
    )


if __name__ == "__main__":
    # Small, deterministic problem with awkward (non-128-multiple) shapes to
    # exercise the padding paths: N=200 nodes, 48 -> 80 features.
    N, F_IN, F_OUT = 200, 48, 80
    key = jax.random.PRNGKey(0)
    kx, ka, kw = jax.random.split(key, 3)

    x = jax.random.normal(kx, (N, F_IN), dtype=jnp.float32)

    # Symmetric, row-normalized adjacency (typical GCN input).
    a = jax.random.uniform(ka, (N, N), dtype=jnp.float32)
    a = (a + a.T) * 0.5 + jnp.eye(N, dtype=jnp.float32)
    adj = a / jnp.sum(a, axis=1, keepdims=True)

    weight = xavier_uniform(kw, F_IN, F_OUT)

    # Default tiling (single k step at this size).
    out = jax.block_until_ready(graph_convolution(x, weight, adj))
    assert out.shape == (N, F_OUT)

    # Smaller contraction tile -> multi-step k accumulation path is exercised.
    out_multi_k = jax.block_until_ready(
        graph_convolution(x, weight, adj, max_k_tile=128)
    )
    assert out_multi_k.shape == (N, F_OUT)

    # Reference 1: bf16-matched plain JAX (same casts as the kernel) -> tight check.
    support_ref = jnp.dot(
        x.astype(jnp.bfloat16), weight.astype(jnp.bfloat16),
        preferred_element_type=jnp.float32,
    ).astype(jnp.bfloat16)
    ref_bf16 = jnp.maximum(
        jnp.dot(adj.astype(jnp.bfloat16), support_ref,
                preferred_element_type=jnp.float32),
        0.0,
    ).astype(jnp.float32)
    assert jnp.allclose(out, ref_bf16, atol=1e-3, rtol=1e-3)
    assert jnp.allclose(out_multi_k, ref_bf16, atol=1e-3, rtol=1e-3)

    # Reference 2: full f32 reference -> bf16 compute stays within loose tolerance.
    ref_f32 = jnp.maximum(adj @ (x @ weight), 0.0)
    assert jnp.allclose(out, ref_f32, atol=3e-2, rtol=3e-2)

    print("KERNEL_OK")
</pallas_src>

<mosaic_0001>
module attributes {stable_mosaic.version = 11 : i64} {
  func.func @kernel(%arg0: i32, %arg1: i32, %arg2: memref<128x256xbf16, #tpu.memory_space<vmem>>, %arg3: memref<256x128xbf16, #tpu.memory_space<vmem>>, %arg4: memref<128x128xf32, #tpu.memory_space<vmem>>, %arg5: memref<128x128xf32, #tpu.memory_space<vmem>>) attributes {dimension_semantics = [#tpu.dimension_semantics<parallel>, #tpu.dimension_semantics<arbitrary>], iteration_bounds = array<i64: 2, 1>, scalar_prefetch = 0 : i64, scratch_operands = 1 : i64, tpu.core_type = #tpu.core_type<tc>, window_params = [{transform_indices = @transform_0, window_bounds = array<i64: 128, 256>}, {pipeline_mode = #tpu.pipeline_mode<synchronous>, transform_indices = @transform_1, window_bounds = array<i64: 256, 128>}, {transform_indices = @transform_2, window_bounds = array<i64: 128, 128>}]} {
    %c0_i32 = arith.constant 0 : i32
    %0 = arith.cmpi eq, %arg1, %c0_i32 : i32
    %1 = arith.extui %0 : i1 to i32
    %c0_i32_0 = arith.constant 0 : i32
    %2 = arith.cmpi ne, %1, %c0_i32_0 : i32
    scf.if %2 {
      %cst_9 = arith.constant 0.000000e+00 : f32
      %15 = vector.broadcast %cst_9 : f32 to vector<128x128xf32>
      %c0_10 = arith.constant 0 : index
      %c0_11 = arith.constant 0 : index
      %16 = vector.load %arg5[%c0_10, %c0_11] : memref<128x128xf32, #tpu.memory_space<vmem>>, vector<128x128xf32>
      tpu.vector_store %arg5[%c0_10, %c0_11], %15 {strides = array<i32>} : memref<128x128xf32, #tpu.memory_space<vmem>>, vector<128x128xf32>,
    } else {
    }
    %c256_i32 = arith.constant 256 : i32
    %3 = arith.muli %arg1, %c256_i32 : i32
    %4 = tpu.assume_multiple %3, 256 : i32
    %5 = arith.index_cast %4 : i32 to index
    %c0 = arith.constant 0 : index
    %6 = vector.load %arg3[%5, %c0] : memref<256x128xbf16, #tpu.memory_space<vmem>>, vector<256x128xbf16>
    %c0_1 = arith.constant 0 : index
    %c0_2 = arith.constant 0 : index
    %7 = vector.load %arg5[%c0_1, %c0_2] : memref<128x128xf32, #tpu.memory_space<vmem>>, vector<128x128xf32>
    %c0_3 = arith.constant 0 : index
    %c0_4 = arith.constant 0 : index
    %8 = vector.load %arg2[%c0_3, %c0_4] : memref<128x256xbf16, #tpu.memory_space<vmem>>, vector<128x256xbf16>
    %cst = arith.constant dense<0.000000e+00> : vector<128x128xf32>
    %9 = tpu.matmul %8, %6, %cst {dimension_numbers = #tpu.dot_dimension_numbers<[1], [0], [0], [1], [0, 0, 1, 1], [], []>} : vector<128x256xbf16>, vector<256x128xbf16>, vector<128x128xf32> -> vector<128x128xf32>
    %10 = arith.addf %7, %9 : vector<128x128xf32>
    %c0_5 = arith.constant 0 : index
    %c0_6 = arith.constant 0 : index
    %11 = vector.load %arg5[%c0_5, %c0_6] : memref<128x128xf32, #tpu.memory_space<vmem>>, vector<128x128xf32>
    tpu.vector_store %arg5[%c0_5, %c0_6], %10 {strides = array<i32>} : memref<128x128xf32, #tpu.memory_space<vmem>>, vector<128x128xf32>,
    %c0_i32_7 = arith.constant 0 : i32
    %12 = arith.cmpi eq, %arg1, %c0_i32_7 : i32
    %13 = arith.extui %12 : i1 to i32
    %c0_i32_8 = arith.constant 0 : i32
    %14 = arith.cmpi ne, %13, %c0_i32_8 : i32
    scf.if %14 {
      %c0_9 = arith.constant 0 : index
      %c0_10 = arith.constant 0 : index
      %15 = vector.load %arg5[%c0_9, %c0_10] : memref<128x128xf32, #tpu.memory_space<vmem>>, vector<128x128xf32>
      %cst_11 = arith.constant 0.000000e+00 : f32
      %16 = vector.broadcast %cst_11 : f32 to vector<128x128xf32>
      %17 = arith.maximumf %15, %16 : vector<128x128xf32>
      %c0_12 = arith.constant 0 : index
      %c0_13 = arith.constant 0 : index
      %18 = vector.load %arg4[%c0_12, %c0_13] : memref<128x128xf32, #tpu.memory_space<vmem>>, vector<128x128xf32>
      tpu.vector_store %arg4[%c0_12, %c0_13], %17 {strides = array<i32>} : memref<128x128xf32, #tpu.memory_space<vmem>>, vector<128x128xf32>,
    } else {
    }
    return
  }
  func.func @transform_0(%arg0: i32, %arg1: i32) -> (i32, i32) {
    %c0_i32 = arith.constant 0 : i32
    return %arg0, %arg1 : i32, i32
  }
  func.func @transform_1(%arg0: i32, %arg1: i32) -> (i32, i32) {
    %c0_i32 = arith.constant 0 : i32
    %c0_i32_0 = arith.constant 0 : i32
    %c0_i32_1 = arith.constant 0 : i32
    return %c0_i32, %c0_i32_0 : i32, i32
  }
  func.func @transform_2(%arg0: i32, %arg1: i32) -> (i32, i32) {
    %c0_i32 = arith.constant 0 : i32
    %c0_i32_0 = arith.constant 0 : i32
    return %arg0, %c0_i32 : i32, i32
  }
}

</mosaic_0001>

<bundles_post_ra>
// kernel: tpu_custom_call.1
= control target key start
LH: loop header
LB: loop body
LE: loop exit
PB: predicated region body
PF: predicated region fallthrough
CT: control target
= control target key end

     0   :  { %7 = vsyncpa [#allocation4], 0  ;;  %s1435_s0 = inlined_call_operand.hbm [shape: bf16[256,256], index: 0, kind: input, shape index: {}]   ;;  %s1436_s1 = inlined_call_operand.hbm [shape: bf16[256,128], index: 1, kind: input, shape index: {}]   ;;  %s1437_s2 = inlined_call_operand.hbm [shape: f32[256,128], index: 2, kind: output, shape index: {}]  }
   0x1   :  { %9 = vsyncpa [#allocation4 + $0x1], 0 }
   0x2   :  { %10 = vsyncpa [#allocation7], 0 }
   0x3   :  { %11 = vsyncpa [#allocation5], 0 }
   0x4   :  { %13 = vsyncpa [#allocation5 + $0x1], 0  ;;  %s1175_s9 = smov 0   ;;  %s1177_s10 = smov 0  }
   0x5   :  { %s1179_s11 = smov 0   ;;  %s1181_s12 = smov 0  }
   0x6   :  { %s1183_s13 = smov 0   ;;  %s1185_s14 = smov 0  }
   0x7 LB: > { %s753_s15 = sadd.s32 4294967295, %s1149_s14   ;;  %s754_s16 = sadd.s32 4294967294, %s1149_s14   ;;  %s1149_s14 = sphi %s1185_s14, %s19_s14   ;;  %s1145_s13 = sphi %s1183_s13, %s1461_s13   ;;  %s1141_s12 = sphi %s1181_s12, %s1460_s12   ;;  %s1137_s11 = sphi %s1179_s11, %s1459_s11   ;;  %s1133_s10 = sphi %s1177_s10, %s1458_s10   ;;  %s1129_s9 = sphi %s1175_s9, %s1457_s9  }
   0x8   : > { %p53_p0 = scmp.ne.s32.totalorder %s1133_s10, %s1129_s9  ;;  %p1209_p1 = scmp.eq.s32.totalorder %s753_s15, 0 }
   0x9   : > { %p1213_p2 = scmp.eq.s32.totalorder %s753_s15, 1  ;;  %p104_p3 = scmp.eq.s32.totalorder %s754_s16, 1 }
   0xa   : > { %s1442_s17 = scalar_select %p1209_p1, 1, 0 }
   0xb   : > { %s1443_s18 = scalar_select %p1213_p2, 1, 0 }
   0xc   : > { %p1219_p4 = por %p1209_p1, %p53_p0  ;;  %p755_p5 = scmp.ge.s32.totalorder %s1149_s14, 1 }
   0xd   : > { %p1224_p6 = por %p104_p3, %p53_p0  ;;  %p111_p7 = scmp.lt.s32.totalorder %s1149_s14, 3 }
   0xe   : > { %s1444_s19 = scalar_select %p1219_p4, 1, 0 }
   0xf   : > { %s1445_s20 = scalar_select %p1224_p6, 1, 0 }
  0x10   : > { %p1229_p8 = pnand %p755_p5, %p111_p7  ;;  %s1151_s22 = smov [#allocation6]  }
  0x11   : > { %s123_s23 = sshll.u32 %s1151_s22, 4  ;;  %s31_s25 = sadd.s32 1, %s1145_s13  ;;  %s124_s23 = int_to_ptr.vmem [resolvable:$true] %s123_s23 }
  0x12   : > { %s1446_s21 = scalar_select %p1229_p8, 1, 0 }
  0x13   : > { %p894_p9 = pneg %p1229_p8  ;;  %s1005_s28 = scalar_lea.hbm %s1436_s1, 2048 }
  0x14   : > { %p1006_p12 = scmp.ne.s32.totalorder %s1436_s1, %s1005_s28  ;;  %p1012_p5 = scmp.lt.u32.totalorder %s1005_s28, %s1436_s1 }
  0x15   : > { %p1238_p11 = pnand %p894_p9, %p1209_p1 }
  0x17   : > { %p1007_p13 = pneg %p1238_p11 }
  0x19   : > { %p1008_p0 = pnand %p1007_p13, %p1006_p12 }
  0x1b   : > { %p1009_p3 = pneg %p1008_p0 }
  0x1d   : > { %p1014_p7 = pnand %p1012_p5, %p1009_p3 }
  0x1f   : > { %1017 = shalt.err (!%p1014_p7)
}
  0x20   : > { %s1018_s5 = scalar_lea.vmem %s124_s23, 2048  ;;  %p1026_p1 = scmp.lt.s32.totalorder %s124_s23, %s124_s23 }
  0x21   : > { %p1019_p9 = scmp.ne.s32.totalorder %s124_s23, %s1018_s5  ;;  %p1027_p4 = scmp.lt.s32.totalorder %s1018_s5, %s1018_s5 }
  0x23   : > { %p1021_p10 = pnand %p1019_p9, %p1007_p13  ;;  %p1028_p8 = por %p1027_p4, %p1026_p1 }
  0x25   : > { %p1022_p6 = pneg %p1021_p10 }
  0x27   : > { %p1029_p2 = pnand %p1028_p8, %p1022_p6 }
  0x29   : > { %1032 = shalt.err (!%p1029_p2)
}
  0x2a   : > { %s1152_s6 = smov 64   ;;  %s1153_s7 = smov 4  }
  0x2b   : > { %897 = dma.hbm_to_vmem [thread:$0]  (!%p1238_p11), %s1436_s1, 2048, %s124_s23, [#allocation7], %s1152_s6, %s1152_s6, %s1153_s7  }
  0x2c   : > { %p33_p1 = scmp.ge.s32.totalorder %s31_s25, 2  ;;  %s40_s16 = sadd.s32 1, %s1137_s11 }
  0x2d   : > { %p47_p2 = scmp.ne.s32.totalorder %s1137_s11, %s1133_s10  ;;  %p48_p4 = scmp.eq.s32.totalorder %s1149_s14, 0 }
  0x2e   : > { %s1463_s25 = smov (%p33_p1, %s31_s25), 0  ;;  %p1449_p8 = scmp.ne.s32.totalorder %s1443_s18, 0 }
  0x2f   : > { %p1265_p6 = por %p48_p4, %p47_p2  ;;  %s35_s24 = ssub.s32 %s1145_s13, %s1463_s25 }
  0x30   : > { %p1271_p10 = por %p1449_p8, %p47_p2  ;;  %p907_p12 = scmp.lt.s32.totalorder %s1149_s14, 2 }
  0x31   : > { %p38_p11 = scmp.eq.s32.totalorder %s35_s24, 0  ;;  %s137_s23 = sand.u32 1, %s1137_s11  }
  0x32   : > { %s758_s27 = sshll.u32 %s137_s23, 7  ;;  %s804_s29 = sshll.u32 %s1145_s13, 11 }
  0x33   : > { %s1280_s28 = scalar_select %p38_p11, %s1137_s11, %s40_s16  }
  0x34   : > { %s1286_s4 = scalar_lea.hbm %s1435_s0, %s804_s29  ;;  %s141_s18 = scalar_lea.vmem [#allocation3], %s758_s27 }
  0x35   : > { %s151_s5 = sshll.u32 %s141_s18, 4  ;;  %p1292_p13 = pnand %p907_p12, %p1265_p6  ;;  %s1288_s5 = int_to_ptr.vmem [resolvable:$true] %s151_s5 }
  0x36   : > { %s1296_s7 = scalar_lea.sflag [#allocation4], %s137_s23  ;;  %s1033_s8 = scalar_lea.hbm %s1286_s4, 2048 }
  0x37   : > { %p1034_p0 = scmp.ne.s32.totalorder %s1286_s4, %s1033_s8  ;;  %p1035_p3 = pneg %p1292_p13 }
  0x38   : > { %s1038_s22 = scalar_lea.hbm %s1435_s0, 4096  ;;  %p1039_p9 = scmp.lt.u32.totalorder %s1286_s4, %s1435_s0 }
  0x39   : > { %p1036_p5 = pnand %p1035_p3, %p1034_p0  ;;  %p1040_p1 = scmp.lt.u32.totalorder %s1038_s22, %s1033_s8 }
  0x3a   : > { %p1042_p4 = scmp.lt.u32.totalorder %s1033_s8, %s1286_s4 }
  0x3b   : > { %p1037_p7 = pneg %p1036_p5  ;;  %p1041_p2 = por %p1040_p1, %p1039_p9 }
  0x3d   : > { %p1043_p6 = por %p1042_p4, %p1041_p2 }
  0x3f   : > { %p1044_p8 = pnand %p1043_p6, %p1037_p7 }
  0x41   : > { %1047 = shalt.err (!%p1044_p8)
}
  0x42   : > { %s1048_s23 = scalar_lea.vmem %s1288_s5, 2048  ;;  %s1154_s29 = smov [#allocation3]  }
  0x43   : > { %p1049_p12 = scmp.ne.s32.totalorder %s1288_s5, %s1048_s23  ;;  %s1053_s30 = sshll.u32 %s1154_s29, 4  ;;  %s1054_s30 = int_to_ptr.vmem [resolvable:$false] %s1053_s30 }
  0x44   : > { %s1055_s3 = scalar_lea.vmem %s1054_s30, 4096  ;;  %p1056_p5 = scmp.lt.s32.totalorder %s1288_s5, %s1054_s30 }
  0x45   : > { %p1051_p11 = pnand %p1049_p12, %p1035_p3  ;;  %p1057_p9 = scmp.lt.s32.totalorder %s1055_s3, %s1048_s23 }
  0x47   : > { %p1052_p0 = pneg %p1051_p11  ;;  %p1058_p1 = por %p1057_p9, %p1056_p5 }
  0x49   : > { %p1059_p2 = pnand %p1058_p1, %p1052_p0 }
  0x4b   : > { %1062 = shalt.err (!%p1059_p2)
}
  0x4c   : > { %s1155_s18 = smov 128   ;;  %s1156_s8 = smov 8  }
  0x4d   : > { %901 = dma.hbm_to_vmem [thread:$0]  (!%p1292_p13), %s1286_s4, 2048, %s1288_s5, %s1296_s7, %s1155_s18, %s1155_s18, %s1156_s8  }
  0x4e   : > { %p1452_p3 = scmp.ne.s32.totalorder %s1446_s21, 0 }
  0x4f   : > { %s1327_s15 = sand.u32 (!%p1452_p3), 1, %s1133_s10   ;;  %p1453_p7 = scmp.ne.s32.totalorder (!%p1452_p3), %s1444_s19, 0 }
  0x50   : > { %163 = sbr.rel (%p1452_p3) target bundleno = 382 (0x17e), region = 28  ;;  %s763_s16 = sshll.u32 (!%p1452_p3), %s1327_s15, 7 }
  0x51   : > { %s166_s22 = scalar_lea.sflag (!%p1452_p3), [#allocation4], %s1327_s15  ;;  %s1333_s24 = scalar_lea.vmem (!%p1452_p3), [#allocation3], %s763_s16 }
  0x57   : > { %1116 = dma.done.wait (%p1453_p7), %s166_s22, 2048  }
  0x58   : > { %1118 = vsyncadd (%p1453_p7), %s166_s22, 4294965248  ;;  %p1454_p13 = scmp.ne.s32.totalorder %s1442_s17, 0 }
  0x5a   : > { %1120 = dma.done.wait (%p1454_p13), [#allocation7], 2048  }
  0x5b   : > { %1122 = vsyncadd (%p1454_p13), [#allocation7], 4294965248  ;;  %v965_v0 = vld [vmem:[#allocation6 + $0x40] sm:$0xff]   ;;  %v967_v2 = vld [vmem:[#allocation6 + $0x48] sm:$0xff]   ;;  %s1361_s17 = scalar_lea.vmem [#allocation8], %s763_s16  ;;  %s805_s19 = sshll.u32 %s1141_s12, 11 }
  0x5c   : > { %v966_v1 = vld [vmem:[#allocation6] sm:$0xff]   ;;  %806 = vmatprep.subr.bf16.mxu0 %v965_v0  ;;  %870 = vmatprep.subr.bf16.mxu1 %v965_v0  ;;  %v968_v3 = vld [vmem:[#allocation6 + $0x8] sm:$0xff]   ;;  %v969_v4 = vld [vmem:[#allocation6 + $0x50] sm:$0xff]   ;;  %s657_s21 = sshll.u32 %s1361_s17, 4  ;;  %s1380_s6 = scalar_lea.hbm %s1437_s2, %s805_s19  ;;  %s1382_s21 = int_to_ptr.vmem [resolvable:$true] %s657_s21 }
  0x5d   : > { %807 = vmatpush3.bf16.msra.mxu0 %v966_v1  ;;  %878 = vmatpush3.bf16.msra.mxu1 %v966_v1  ;;  %v970_v5 = vld [vmem:[#allocation6 + $0x10] sm:$0xff]   ;;  %v971_v6 = vld [vmem:[#allocation6 + $0x58] sm:$0xff]   ;;  %v973_v8 = vld [vmem:[#allocation6 + $0x60] sm:$0xff]   ;;  %s644_s12 = scalar_lea.sflag [#allocation5], %s1327_s15  ;;  %s1063_s7 = scalar_lea.vmem %s1382_s21, 2048 }
  0x5e   : > { %808 = vmatprep.subr.bf16.mxu0 %v967_v2  ;;  %871 = vmatprep.subr.bf16.mxu1 %v967_v2  ;;  %v972_v7 = vld [vmem:[#allocation6 + $0x18] sm:$0xff]   ;;  %v974_v9 = vld [vmem:[#allocation6 + $0x20] sm:$0xff]   ;;  %v975_v10 = vld [vmem:[#allocation6 + $0x68] sm:$0xff]   ;;  %p1064_p4 = scmp.ne.s32.totalorder %s1382_s21, %s1063_s7  ;;  %s1157_s27 = smov [#allocation8]  }
  0x5f   : > { %v983_v11 = vld [vmem:[%s1333_s24 + $0x4] ss:$8 sps:$4 sm:$0xff]   ;;  %v977_v14 = vld [vmem:[#allocation6 + $0x70] sm:$0xff]   ;;  %v979_v16 = vld [vmem:[#allocation6 + $0x78] sm:$0xff]   ;;  %s1067_s23 = sshll.u32 %s1157_s27, 4  ;;  %s1068_s23 = int_to_ptr.vmem [resolvable:$false] %s1067_s23 }
  0x60   : > { %v986_v12 = vld [vmem:[%s1333_s24 + $0x44] ss:$8 sps:$4 sm:$0xff]   ;;  %495 = vmatprep.mubr.bf16.mxu0 %v983_v11  ;;  %v978_v15 = vld [vmem:[#allocation6 + $0x30] sm:$0xff]   ;;  %v980_v17 = vld [vmem:[#allocation6 + $0x38] sm:$0xff]   ;;  %p1065_p6 = pnand %p1064_p4, %p1271_p10  ;;  %s1069_s29 = scalar_lea.vmem %s1068_s23, 4096 }
  0x61   : > { %809 = vmatpush3.bf16.msra.mxu0 %v968_v3  ;;  %879 = vmatpush3.bf16.msra.mxu1 %v968_v3  ;;  %v976_v13 = vld [vmem:[#allocation6 + $0x28] sm:$0xff]   ;;  %v987_v20 = vld [vmem:[%s1333_s24 + $0x14] ss:$8 sps:$4 sm:$0xff]   ;;  %v991_v22 = vld [vmem:[%s1333_s24 + $0x10] ss:$8 sps:$4 sm:$0xff]   ;;  %p1070_p12 = scmp.lt.s32.totalorder %s1382_s21, %s1068_s23  ;;  %p1071_p11 = scmp.lt.s32.totalorder %s1069_s29, %s1063_s7 }
  0x62   : > { %810 = vmatprep.subr.bf16.mxu0 %v969_v4  ;;  %872 = vmatprep.subr.bf16.mxu1 %v969_v4  ;;  %v981_v18 = vld [vmem:[%s1333_s24] ss:$8 sps:$4 sm:$0xff]   ;;  %v989_v21 = vld [vmem:[%s1333_s24 + $0x54] ss:$8 sps:$4 sm:$0xff]   ;;  %v992_v23 = vld [vmem:[%s1333_s24 + $0x50] ss:$8 sps:$4 sm:$0xff]   ;;  %p1066_p8 = pneg %p1065_p6 }
  0x63   : > { %527 = vmatprep.mubr.bf16.mxu1 %v986_v12  ;;  %v984_v19 = vld [vmem:[%s1333_s24 + $0x40] ss:$8 sps:$4 sm:$0xff]   ;;  %v993_v24 = vld [vmem:[%s1333_s24 + $0x24] ss:$8 sps:$4 sm:$0xff]   ;;  %v999_v28 = vld [vmem:[%s1333_s24 + $0x34] ss:$8 sps:$4 sm:$0xff]   ;;  %p1072_p0 = por %p1071_p11, %p1070_p12 }
  0x64   : > { %v995_v25 = vld [vmem:[%s1333_s24 + $0x64] ss:$8 sps:$4 sm:$0xff]   ;;  %v997_v26 = vld [vmem:[%s1333_s24 + $0x20] ss:$8 sps:$4 sm:$0xff]   ;;  %v1001_v29 = vld [vmem:[%s1333_s24 + $0x74] ss:$8 sps:$4 sm:$0xff]  }
  0x65   : > { %811 = vmatpush3.bf16.msra.mxu0 %v970_v5  ;;  %880 = vmatpush3.bf16.msra.mxu1 %v970_v5  ;;  %v998_v27 = vld [vmem:[%s1333_s24 + $0x60] ss:$8 sps:$4 sm:$0xff]   ;;  %v1003_v30 = vld [vmem:[%s1333_s24 + $0x30] ss:$8 sps:$4 sm:$0xff]   ;;  %p1073_p5 = pnand %p1072_p0, %p1066_p8 }
  0x66   : > { %812 = vmatprep.subr.bf16.mxu0 %v971_v6  ;;  %873 = vmatprep.subr.bf16.mxu1 %v971_v6  ;;  %v1004_v31 = vld [vmem:[%s1333_s24 + $0x70] ss:$8 sps:$4 sm:$0xff]  }
  0x69   : > { %813 = vmatpush3.bf16.msra.mxu0 %v972_v7  ;;  %881 = vmatpush3.bf16.msra.mxu1 %v972_v7 }
  0x6a   : > { %814 = vmatprep.subr.bf16.mxu0 %v973_v8  ;;  %874 = vmatprep.subr.bf16.mxu1 %v973_v8 }
  0x6d   : > { %815 = vmatpush3.bf16.msra.mxu0 %v974_v9  ;;  %882 = vmatpush3.bf16.msra.mxu1 %v974_v9 }
  0x6e   : > { %816 = vmatprep.subr.bf16.mxu0 %v975_v10  ;;  %875 = vmatprep.subr.bf16.mxu1 %v975_v10 }
  0x71   : > { %817 = vmatpush3.bf16.msra.mxu0 %v976_v13  ;;  %883 = vmatpush3.bf16.msra.mxu1 %v976_v13 }
  0x72   : > { %818 = vmatprep.subr.bf16.mxu0 %v977_v14  ;;  %876 = vmatprep.subr.bf16.mxu1 %v977_v14 }
  0x75   : > { %819 = vmatpush3.bf16.msra.mxu0 %v978_v15  ;;  %884 = vmatpush3.bf16.msra.mxu1 %v978_v15 }
  0x76   : > { %820 = vmatprep.subr.bf16.mxu0 %v979_v16  ;;  %877 = vmatprep.subr.bf16.mxu1 %v979_v16 }
  0x79   : > { %821 = vmatpush3.bf16.msra.mxu0 %v980_v17  ;;  %885 = vmatpush3.bf16.msra.mxu1 %v980_v17 }
  0x7c   : > { %496 = vmatmul.mubr.bf16.vlgmr.msra.gmra.mrb[0].mxu0 %v981_v18  ;;  %528 = vmatmul.mubr.bf16.vlgmr.msra.gmra.mrb[0].mxu1 %v984_v19 }
  0x7d   : > { %503 = vmatprep.mubr.bf16.mxu0 %v987_v20  ;;  %535 = vmatprep.mubr.bf16.mxu1 %v989_v21 }
  0x84   : > { %504 = vmatmul.mubr.bf16.gmra.mrb[4].mxu0 %v991_v22  ;;  %536 = vmatmul.mubr.bf16.gmra.mrb[4].mxu1 %v992_v23 }
  0x85   : > { %511 = vmatprep.mubr.bf16.mxu0 %v993_v24  ;;  %543 = vmatprep.mubr.bf16.mxu1 %v995_v25 }
  0x8c   : > { %512 = vmatmul.mubr.bf16.gmra.mrb[8].mxu0 %v997_v26  ;;  %544 = vmatmul.mubr.bf16.gmra.mrb[8].mxu1 %v998_v27 }
  0x8d   : > { %519 = vmatprep.mubr.bf16.mxu0 %v999_v28  ;;  %551 = vmatprep.mubr.bf16.mxu1 %v1001_v29 }
  0x94   : > { %520 = vmatmul.mubr.bf16.gmra.mrb[12].mxu0 %v1003_v30  ;;  %552 = vmatmul.mubr.bf16.gmra.mrb[12].mxu1 %v1004_v31 }
 0x14f   : > { %v822_v32 = vpop.f32.mrb[0].mxu0  ;;  %v846_v33 = vpop.f32.mrb[0].mxu1 }
 0x150   : > { %v823_v34 = vpop.f32.mrb[1].mxu0  ;;  %v847_v35 = vpop.f32.mrb[1].mxu1 }
 0x151   : > { %v824_v36 = vadd.f32 %v823_v34, %v822_v32  ;;  %v848_v37 = vadd.f32 %v847_v35, %v846_v33  ;;  %v825_v38 = vpop.f32.mrb[2].mxu0  ;;  %v849_v39 = vpop.f32.mrb[2].mxu1 }
 0x152   : > { %v826_v40 = vpop.f32.mrb[3].mxu0  ;;  %v850_v41 = vpop.f32.mrb[3].mxu1 }
 0x153   : > { %v611_v42 = vmax.f32 %v824_v36, 0.0  ;;  %v619_v43 = vmax.f32 %v848_v37, 0.0  ;;  %v827_v44 = vadd.f32 %v826_v40, %v825_v38  ;;  %v851_v45 = vadd.f32 %v850_v41, %v849_v39 }
 0x155   : > { %627 = vst [vmem:[%s1361_s17] sm:$0xff] %v611_v42  ;;  %635 = vst [vmem:[%s1361_s17 + $0x40] sm:$0xff] %v619_v43  ;;  %v612_v46 = vmax.f32 %v827_v44, 0.0  ;;  %v620_v47 = vmax.f32 %v851_v45, 0.0 }
 0x157   : > { %628 = vst [vmem:[%s1361_s17 + $0x8] sm:$0xff] %v612_v46  ;;  %636 = vst [vmem:[%s1361_s17 + $0x48] sm:$0xff] %v620_v47  ;;  %v828_v48 = vpop.f32.mrb[4].mxu0  ;;  %v852_v49 = vpop.f32.mrb[4].mxu1 }
 0x158   : > { %v829_v50 = vpop.f32.mrb[5].mxu0  ;;  %v853_v51 = vpop.f32.mrb[5].mxu1 }
 0x159   : > { %v830_v52 = vadd.f32 %v829_v50, %v828_v48  ;;  %v854_v53 = vadd.f32 %v853_v51, %v852_v49  ;;  %v831_v54 = vpop.f32.mrb[6].mxu0  ;;  %v855_v55 = vpop.f32.mrb[6].mxu1 }
 0x15a   : > { %v832_v56 = vpop.f32.mrb[7].mxu0  ;;  %v856_v57 = vpop.f32.mrb[7].mxu1 }
 0x15b   : > { %v613_v58 = vmax.f32 %v830_v52, 0.0  ;;  %v621_v59 = vmax.f32 %v854_v53, 0.0  ;;  %v833_v60 = vadd.f32 %v832_v56, %v831_v54  ;;  %v857_v61 = vadd.f32 %v856_v57, %v855_v55 }
 0x15d   : > { %629 = vst [vmem:[%s1361_s17 + $0x10] sm:$0xff] %v613_v58  ;;  %637 = vst [vmem:[%s1361_s17 + $0x50] sm:$0xff] %v621_v59  ;;  %v614_v62 = vmax.f32 %v833_v60, 0.0  ;;  %v622_v63 = vmax.f32 %v857_v61, 0.0 }
 0x15f   : > { %630 = vst [vmem:[%s1361_s17 + $0x18] sm:$0xff] %v614_v62  ;;  %638 = vst [vmem:[%s1361_s17 + $0x58] sm:$0xff] %v622_v63  ;;  %v834_v0 = vpop.f32.mrb[8].mxu0  ;;  %v858_v1 = vpop.f32.mrb[8].mxu1 }
 0x160   : > { %v835_v2 = vpop.f32.mrb[9].mxu0  ;;  %v859_v3 = vpop.f32.mrb[9].mxu1 }
 0x161   : > { %v836_v4 = vadd.f32 %v835_v2, %v834_v0  ;;  %v860_v5 = vadd.f32 %v859_v3, %v858_v1  ;;  %v837_v6 = vpop.f32.mrb[10].mxu0  ;;  %v861_v7 = vpop.f32.mrb[10].mxu1 }
 0x162   : > { %v838_v8 = vpop.f32.mrb[11].mxu0  ;;  %v862_v9 = vpop.f32.mrb[11].mxu1 }
 0x163   : > { %v615_v10 = vmax.f32 %v836_v4, 0.0  ;;  %v623_v11 = vmax.f32 %v860_v5, 0.0  ;;  %v839_v12 = vadd.f32 %v838_v8, %v837_v6  ;;  %v863_v13 = vadd.f32 %v862_v9, %v861_v7 }
 0x165   : > { %631 = vst [vmem:[%s1361_s17 + $0x20] sm:$0xff] %v615_v10  ;;  %639 = vst [vmem:[%s1361_s17 + $0x60] sm:$0xff] %v623_v11  ;;  %v616_v14 = vmax.f32 %v839_v12, 0.0  ;;  %v624_v15 = vmax.f32 %v863_v13, 0.0 }
 0x167   : > { %632 = vst [vmem:[%s1361_s17 + $0x28] sm:$0xff] %v616_v14  ;;  %640 = vst [vmem:[%s1361_s17 + $0x68] sm:$0xff] %v624_v15  ;;  %v840_v16 = vpop.f32.mrb[12].mxu0  ;;  %v864_v17 = vpop.f32.mrb[12].mxu1 }
 0x168   : > { %v841_v18 = vpop.f32.mrb[13].mxu0  ;;  %v865_v19 = vpop.f32.mrb[13].mxu1 }
 0x169   : > { %v842_v20 = vadd.f32 %v841_v18, %v840_v16  ;;  %v866_v21 = vadd.f32 %v865_v19, %v864_v17  ;;  %v843_v22 = vpop.f32.mrb[14].mxu0  ;;  %v867_v23 = vpop.f32.mrb[14].mxu1 }
 0x16a   : > { %v844_v24 = vpop.f32.mrb[15].mxu0  ;;  %v868_v25 = vpop.f32.mrb[15].mxu1 }
 0x16b   : > { %v617_v26 = vmax.f32 %v842_v20, 0.0  ;;  %v625_v27 = vmax.f32 %v866_v21, 0.0  ;;  %v845_v28 = vadd.f32 %v844_v24, %v843_v22  ;;  %v869_v29 = vadd.f32 %v868_v25, %v867_v23 }
 0x16d   : > { %633 = vst [vmem:[%s1361_s17 + $0x30] sm:$0xff] %v617_v26  ;;  %641 = vst [vmem:[%s1361_s17 + $0x70] sm:$0xff] %v625_v27  ;;  %v618_v30 = vmax.f32 %v845_v28, 0.0  ;;  %v626_v31 = vmax.f32 %v869_v29, 0.0 }
 0x16f   : > { %634 = vst [vmem:[%s1361_s17 + $0x38] sm:$0xff] %v618_v30  ;;  %642 = vst [vmem:[%s1361_s17 + $0x78] sm:$0xff] %v626_v31 }
 0x170   : > { %1076 = shalt.err (!%p1073_p5)
}
 0x171   : > { %s1077_s30 = scalar_lea.hbm %s1380_s6, 2048  ;;  %s1081_s8 = scalar_lea.hbm %s1437_s2, 4096 }
 0x172   : > { %p1078_p9 = scmp.ne.s32.totalorder %s1380_s6, %s1077_s30  ;;  %p1082_p3 = scmp.lt.u32.totalorder %s1380_s6, %s1437_s2 }
 0x173   : > { %p1083_p7 = scmp.lt.u32.totalorder %s1081_s8, %s1077_s30  ;;  %p1085_p4 = scmp.lt.u32.totalorder %s1077_s30, %s1380_s6 }
 0x174   : > { %p1079_p1 = pnand %p1078_p9, %p1271_p10 }
 0x175   : > { %p1084_p13 = por %p1083_p7, %p1082_p3 }
 0x176   : > { %p1080_p2 = pneg %p1079_p1 }
 0x177   : > { %p1086_p6 = por %p1085_p4, %p1084_p13 }
 0x179   : > { %p1087_p8 = pnand %p1086_p6, %p1080_p2 }
 0x17b   : > { %1090 = shalt.err (!%p1087_p8)
}
 0x17c   : > { %s1158_s24 = smov 128   ;;  %s1159_s17 = smov 8  }
 0x17d   : > { %892 = dma.vmem_to_hbm [thread:$0]  (%p1271_p10), %s1382_s21, 2048, %s1380_s6, %s644_s12, %s1158_s24, %s1158_s24, %s1159_s17  }
 0x17e PF: > { %s672_s19 = sand.u32 1, %s1129_s9   ;;  %p1455_p12 = scmp.ne.s32.totalorder %s1445_s20, 0 }
 0x17f   : > { %p1456_p11 = scmp.ge.s32.totalorder %s1149_s14, 2  ;;  %s673_s4 = scalar_lea.sflag [#allocation5], %s672_s19 }
 0x181   : > { %p903_p0 = pnand %p1456_p11, %p1455_p12 }
 0x183   : > { %1124 = dma.done.wait (!%p903_p0), %s673_s4, 2048  }
 0x184   : > { %1126 = vsyncadd (!%p903_p0), %s673_s4, 4294965248  ;;  %s19_s14 = sadd.s32 1, %s1149_s14   ;;  %s1457_s9 = smov %s1133_s10 }
 0x185   : > { %p16_p5 = scmp.ge.s32.totalorder %s19_s14, 4   ;;  %s1458_s10 = smov %s1137_s11 }
 0x186   : > { %s1459_s11 = smov %s1280_s28  ;;  %s1460_s12 = smov %s1145_s13 }
 0x187   : > { %s1461_s13 = smov %s1463_s25  ;;  %18 = sbr.rel (!%p16_p5) target bundleno = 7 (0x7), region = 86 }
 0x18e   :  { %678 = vsyncpa [#allocation4], 1 }
 0x18f   :  { %680 = vsyncpa [#allocation4 + $0x1], 1 }
 0x190   :  { %681 = vsyncpa [#allocation7], 1 }
 0x191   :  { %682 = vsyncpa [#allocation5], 1 }
 0x192   :  { %684 = vsyncpa [#allocation5 + $0x1], 1 }

</bundles_post_ra>
